<compile_context>
chip_gen: v7x
topology: tpu7x:2x2x1
jax: 0.10.0
libtpu: 0.0.40
codegen_flags: <defaults>
</compile_context>

<pallas_src>
import functools

import jax
import jax.numpy as jnp
from jax.experimental import pallas as pl
from jax.experimental.pallas import tpu as pltpu

_LANE = 128
_TARGET_BLOCK_BYTES = 4 * 1024 * 1024    # ~4 MiB per input buffer per grid step
_VMEM_LIMIT_BYTES = 40 * 1024 * 1024     # safe on v5e/v6e (128 MiB) and v7x (64 MiB)
_SMALL_ELEMS = 128 * 1024                # fused single-block path below this


# ---------------------------------------------------------------------------
# Layout helpers
# ---------------------------------------------------------------------------
def _choose_cols(n: int) -> int:
    """Largest lane-dense column count (multiple of 128) dividing n."""
    for cand in (8192, 4096, 2048, 1024, 512, 256, 128):
        if n % cand == 0:
            return cand
    raise ValueError("caller must guarantee n % 128 == 0")


def _choose_block_rows(rows: int, cols: int, itemsize: int) -> int:
    """Row-block targeting ~4 MiB per input buffer; multiple of 8; dtype-aware.

    Does NOT need to divide rows: the grid uses cdiv and the ragged tail block
    is masked in-kernel, so awkward row counts can never blow up block size.
    """
    target_rows = max(8, _TARGET_BLOCK_BYTES // (itemsize * cols))
    br = 8
    while br * 2 <= target_rows:
        br *= 2
    rows8 = -(-rows // 8) * 8                 # round rows up to a multiple of 8
    return max(8, min(br, rows8))


# ---------------------------------------------------------------------------
# Fused single-block kernel (small tensors): whole arrays live in VMEM.
# ---------------------------------------------------------------------------
def _fused_small_kernel(x_ref, y_ref, o_ref, *, sigma, inv_total):
    xf = x_ref[...].astype(jnp.float32)
    yf = y_ref[...].astype(jnp.float32)
    d = xf - yf
    mse = jnp.sum(d * d) * inv_total
    o_ref[...] = (mse + sigma * jnp.log(xf)).astype(o_ref.dtype)


# ---------------------------------------------------------------------------
# Pass 1: partial sums of (x - y)^2.
#   grid = (P, K): P "parallel" partial sweeps (megacore), K "arbitrary" steps.
#   Output: (P, 1, 128) f32, each block filled with that sweep's partial sum.
# ---------------------------------------------------------------------------
def _sumsq_kernel(x_ref, y_ref, out_ref, acc_ref, *, kin, block_rows, rows):
    pi = pl.program_id(0)
    i = pl.program_id(1)

    @pl.when(i == 0)
    def _init():
        acc_ref[...] = jnp.zeros_like(acc_ref)

    # Intended (unclamped) row-block index; the index_map clamps the DMA, this
    # mask zeroes both the ragged tail rows and fully out-of-range blocks.
    blk = pi * kin + i
    row0 = blk * block_rows
    row_ids = row0 + jax.lax.broadcasted_iota(jnp.int32, (block_rows, 1), 0)
    valid = row_ids < rows

    d = x_ref[...].astype(jnp.float32) - y_ref[...].astype(jnp.float32)
    dd = jnp.where(valid, d * d, 0.0)
    # Sublane reduce to a (1, cols) strip each step (XLU work, hidden behind
    # the HBM-bound DMA); keeps the accumulator tiny in VMEM.
    acc_ref[...] += jnp.sum(dd, axis=0, keepdims=True)

    @pl.when(i == pl.num_programs(1) - 1)
    def _finalize():
        s = jnp.sum(acc_ref[...])             # one cross-lane reduce per sweep
        out_ref[...] = jnp.full(out_ref.shape, s, dtype=jnp.float32)


def _partial_sumsq(x2d: jax.Array, y2d: jax.Array, block_rows: int) -> jax.Array:
    rows, cols = x2d.shape
    nb = pl.cdiv(rows, block_rows)
    p = 2 if nb >= 2 else 1                   # keep both v7x TensorCores busy
    kin = pl.cdiv(nb, p)
    clamp = nb - 1

    def in_map(pi, i):
        return (jnp.minimum(pi * kin + i, clamp), 0)

    n = rows * cols
    itemsize = x2d.dtype.itemsize
    cost = pl.CostEstimate(flops=3 * n, transcendentals=0,
                           bytes_accessed=2 * n * itemsize + p * _LANE * 4)

    return pl.pallas_call(
        functools.partial(_sumsq_kernel, kin=kin, block_rows=block_rows, rows=rows),
        out_shape=jax.ShapeDtypeStruct((p, 1, _LANE), jnp.float32),
        grid_spec=pltpu.PrefetchScalarGridSpec(
            num_scalar_prefetch=0,
            grid=(p, kin),
            in_specs=[
                pl.BlockSpec((block_rows, cols), in_map),
                pl.BlockSpec((block_rows, cols), in_map),
            ],
            out_specs=pl.BlockSpec((1, 1, _LANE), lambda pi, i: (pi, 0, 0)),
            scratch_shapes=[pltpu.VMEM((1, cols), jnp.float32)],
        ),
        compiler_params=pltpu.CompilerParams(
            dimension_semantics=("parallel", "arbitrary"),
            vmem_limit_bytes=_VMEM_LIMIT_BYTES,
        ),
        cost_estimate=cost,
    )(x2d, y2d)


# ---------------------------------------------------------------------------
# Pass 2: out = sum(partials)/N + sigma * log(x)   (elementwise, parallel)
# ---------------------------------------------------------------------------
def _lognormal_kernel(psum_ref, x_ref, o_ref, *, sigma, inv_total):
    # Each partial arrives broadcast across 128 lanes -> divide the lane factor
    # back out (exact power-of-two scaling).
    mse = jnp.sum(psum_ref[...]) * (inv_total / float(_LANE))
    xf = x_ref[...].astype(jnp.float32)
    o_ref[...] = (mse + sigma * jnp.log(xf)).astype(o_ref.dtype)


def _lognormal_elementwise(psum: jax.Array, x2d: jax.Array, sigma: float,
                           inv_total: float, block_rows: int) -> jax.Array:
    rows, cols = x2d.shape
    nb = pl.cdiv(rows, block_rows)
    p = psum.shape[0]
    n = rows * cols
    itemsize = x2d.dtype.itemsize
    cost = pl.CostEstimate(flops=2 * n, transcendentals=n,
                           bytes_accessed=2 * n * itemsize)

    return pl.pallas_call(
        functools.partial(_lognormal_kernel, sigma=sigma, inv_total=inv_total),
        out_shape=jax.ShapeDtypeStruct((rows, cols), x2d.dtype),
        grid_spec=pltpu.PrefetchScalarGridSpec(
            num_scalar_prefetch=0,
            grid=(nb,),
            in_specs=[
                # Tiny partial-sum array: constant index map -> fetched once,
                # stays resident in VMEM.
                pl.BlockSpec((p, 1, _LANE), lambda i: (0, 0, 0)),
                pl.BlockSpec((block_rows, cols), lambda i: (i, 0)),
            ],
            out_specs=pl.BlockSpec((block_rows, cols), lambda i: (i, 0)),
        ),
        compiler_params=pltpu.CompilerParams(
            dimension_semantics=("parallel",),
            vmem_limit_bytes=_VMEM_LIMIT_BYTES,
        ),
        cost_estimate=cost,
    )(psum, x2d)


# ---------------------------------------------------------------------------
# Wrapper: LogNormalLoss forward
# ---------------------------------------------------------------------------
def log_normal_loss(x: jax.Array, y: jax.Array, sigma: float = 1.0) -> jax.Array:
    """out = mean((x - y)^2) + sigma * log(x); same shape/dtype as x."""
    assert x.shape == y.shape, "x and y must have the same shape"
    orig_shape = x.shape
    total = x.size
    sigma = float(sigma)
    inv_total = 1.0 / float(total)

    # Small tensors: one fused single-block kernel (no padding, one dispatch).
    if total <= _SMALL_ELEMS:
        shp2 = (total // _LANE, _LANE) if total % _LANE == 0 else (1, total)
        x2 = x.reshape(shp2)
        y2 = y.reshape(shp2)
        cost = pl.CostEstimate(flops=5 * total, transcendentals=total,
                               bytes_accessed=3 * total * x.dtype.itemsize)
        out2 = pl.pallas_call(
            functools.partial(_fused_small_kernel, sigma=sigma, inv_total=inv_total),
            out_shape=jax.ShapeDtypeStruct(shp2, x.dtype),
            cost_estimate=cost,
        )(x2, y2)
        return out2.reshape(orig_shape)

    if total % _LANE != 0:
        # TODO(synk): large non-lane-aligned tensors fall back to fused XLA ops;
        # a 1-D masked-tail Pallas kernel would cover them without padding copies.
        xf = x.astype(jnp.float32)
        mse = jnp.mean((xf - y.astype(jnp.float32)) ** 2)
        return (mse + sigma * jnp.log(xf)).astype(x.dtype)

    # Large, lane-aligned: two-pass pipelined path. No padding, no output slice.
    cols = _choose_cols(total)
    rows = total // cols
    block_rows = _choose_block_rows(rows, cols, x.dtype.itemsize)

    x2d = x.reshape(rows, cols)               # no dtype cast: cast in-kernel
    y2d = y.reshape(rows, cols)

    psum = _partial_sumsq(x2d, y2d, block_rows)              # (P, 1, 128) f32
    out2d = _lognormal_elementwise(psum, x2d, sigma, inv_total, block_rows)
    return out2d.reshape(orig_shape)


if __name__ == "__main__":
    sigma = 1.0

    # Small shape (fused single-block kernel path): NCHW batch=2, channels=4, 16x16.
    key = jax.random.PRNGKey(0)
    kx, ky = jax.random.split(key)
    shape = (2, 4, 16, 16)
    # x must be positive (log(x) in the loss).
    x = jax.random.uniform(kx, shape, jnp.float32, minval=0.1, maxval=2.0)
    y = jax.random.uniform(ky, shape, jnp.float32, minval=0.1, maxval=2.0)

    out = jax.block_until_ready(log_normal_loss(x, y, sigma=sigma))
    ref = jnp.mean((x - y) ** 2) + sigma * jnp.log(x)
    assert out.shape == shape and out.dtype == x.dtype
    assert jnp.allclose(out, ref, atol=1e-5, rtol=1e-5), "small-path mismatch"

    # Larger shape: exercises the two-pass path (megacore split P=2, clamped
    # out-of-range block and ragged-tail row masking: 288 rows, 128-row blocks).
    shape_l = (16, 16, 96, 96)
    kx2, ky2 = jax.random.split(jax.random.PRNGKey(1))
    xl = jax.random.uniform(kx2, shape_l, jnp.float32, minval=0.1, maxval=2.0)
    yl = jax.random.uniform(ky2, shape_l, jnp.float32, minval=0.1, maxval=2.0)

    outl = jax.block_until_ready(log_normal_loss(xl, yl, sigma=sigma))
    refl = jnp.mean((xl - yl) ** 2) + sigma * jnp.log(xl)
    assert outl.shape == shape_l and outl.dtype == xl.dtype
    assert jnp.allclose(outl, refl, atol=1e-4, rtol=1e-4), "large-path mismatch"

    print("KERNEL_OK")
</pallas_src>

<mosaic_0001>
module attributes {stable_mosaic.version = 11 : i64} {
  func.func @_fused_small_kernel(%arg0: memref<16x128xf32, #tpu.memory_space<vmem>>, %arg1: memref<16x128xf32, #tpu.memory_space<vmem>>, %arg2: memref<16x128xf32, #tpu.memory_space<vmem>>) attributes {dimension_semantics = [], scalar_prefetch = 0 : i64, scratch_operands = 0 : i64, tpu.core_type = #tpu.core_type<tc>} {
    %c0 = arith.constant 0 : index
    %c0_0 = arith.constant 0 : index
    %0 = vector.load %arg0[%c0, %c0_0] : memref<16x128xf32, #tpu.memory_space<vmem>>, vector<16x128xf32>
    %c0_1 = arith.constant 0 : index
    %c0_2 = arith.constant 0 : index
    %1 = vector.load %arg1[%c0_1, %c0_2] : memref<16x128xf32, #tpu.memory_space<vmem>>, vector<16x128xf32>
    %2 = arith.subf %0, %1 : vector<16x128xf32>
    %3 = arith.mulf %2, %2 : vector<16x128xf32>
    %4 = vector.shape_cast %3 : vector<16x128xf32> to vector<1x16x128xf32>
    %cst = arith.constant dense<0.000000e+00> : vector<1xf32>
    %5 = vector.multi_reduction <add>, %4, %cst [1, 2] : vector<1x16x128xf32> to vector<1xf32>
    %6 = vector.shape_cast %5 : vector<1xf32> to vector<1x1x1xf32>
    %7 = vector.extract %6[0, 0, 0] : f32 from vector<1x1x1xf32>
    %cst_3 = arith.constant 4.8828125E-4 : f32
    %8 = arith.mulf %7, %cst_3 : f32
    %9 = math.log %0 : vector<16x128xf32>
    %cst_4 = arith.constant 1.000000e+00 : f32
    %10 = vector.broadcast %cst_4 : f32 to vector<16x128xf32>
    %11 = arith.mulf %10, %9 : vector<16x128xf32>
    %12 = vector.broadcast %8 : f32 to vector<16x128xf32>
    %13 = arith.addf %12, %11 : vector<16x128xf32>
    %c0_5 = arith.constant 0 : index
    %c0_6 = arith.constant 0 : index
    %14 = vector.load %arg2[%c0_5, %c0_6] : memref<16x128xf32, #tpu.memory_space<vmem>>, vector<16x128xf32>
    tpu.vector_store %arg2[%c0_5, %c0_6], %13 {strides = array<i32>} : memref<16x128xf32, #tpu.memory_space<vmem>>, vector<16x128xf32>,
    return
  }
}

</mosaic_0001>

<bundles_post_ra>
// kernel: tpu_custom_call.1
= control target key start
LH: loop header
LB: loop body
LE: loop exit
PB: predicated region body
PF: predicated region fallthrough
CT: control target
= control target key end

     0   :  { %7 = vsyncpa [#allocation3], 0  ;;  %s234_s0 = inlined_call_operand.hbm [shape: f32[16,128], index: 0, kind: input, shape index: {}]   ;;  %s235_s1 = inlined_call_operand.hbm [shape: f32[16,128], index: 1, kind: input, shape index: {}]   ;;  %s236_s2 = inlined_call_operand.hbm [shape: f32[16,128], index: 2, kind: output, shape index: {}]  }
   0x1   :  { %8 = vsyncpa [#allocation6], 0 }
   0x2   :  { %9 = vsyncpa [#allocation4], 0  ;;  %s169_s9 = smov [#allocation2]   ;;  %s97_s13 = scalar_lea.hbm %s234_s0, 256 }
   0x3   :  { %s15_s10 = sshll.u32 %s169_s9, 4  ;;  %p98_p0 = scmp.ne.s32.totalorder %s234_s0, %s97_s13  ;;  %s16_s10 = int_to_ptr.vmem [resolvable:$true] %s15_s10 }
   0x4   :  { %p101_p1 = scmp.lt.u32.totalorder %s97_s13, %s234_s0 }
   0x6   :  { %p103_p2 = pnand %p101_p1, %p98_p0 }
   0x8   :  { %106 = shalt.err (!%p103_p2)
}
   0x9   :  { %s107_s18 = scalar_lea.vmem %s16_s10, 256  ;;  %p112_p4 = scmp.lt.s32.totalorder %s16_s10, %s16_s10 }
   0xa   :  { %p108_p3 = scmp.ne.s32.totalorder %s16_s10, %s107_s18  ;;  %p113_p5 = scmp.lt.s32.totalorder %s107_s18, %s107_s18 }
   0xc   :  { %p114_p6 = por %p113_p5, %p112_p4 }
   0xe   :  { %p115_p7 = pnand %p114_p6, %p108_p3 }
  0x10   :  { %118 = shalt.err (!%p115_p7)
}
  0x11   :  { %s170_s19 = smov 128   ;;  %s171_s20 = smov 8  }
  0x12   :  { %21 = dma.hbm_to_vmem [thread:$0]  %s234_s0, 256, %s16_s10, [#allocation3], %s170_s19, %s170_s19, %s171_s20  }
  0x13   :  { %s172_s23 = smov [#allocation5]   ;;  %s119_s27 = scalar_lea.hbm %s235_s1, 256 }
  0x14   :  { %s27_s24 = sshll.u32 %s172_s23, 4  ;;  %p120_p8 = scmp.ne.s32.totalorder %s235_s1, %s119_s27  ;;  %s28_s24 = int_to_ptr.vmem [resolvable:$true] %s27_s24 }
  0x15   :  { %p123_p9 = scmp.lt.u32.totalorder %s119_s27, %s235_s1 }
  0x17   :  { %p125_p10 = pnand %p123_p9, %p120_p8 }
  0x19   :  { %128 = shalt.err (!%p125_p10)
}
  0x1a   :  { %s129_s4 = scalar_lea.vmem %s28_s24, 256  ;;  %p134_p12 = scmp.lt.s32.totalorder %s28_s24, %s28_s24 }
  0x1b   :  { %p130_p11 = scmp.ne.s32.totalorder %s28_s24, %s129_s4  ;;  %p135_p13 = scmp.lt.s32.totalorder %s129_s4, %s129_s4 }
  0x1d   :  { %p136_p0 = por %p135_p13, %p134_p12 }
  0x1f   :  { %p137_p1 = pnand %p136_p0, %p130_p11 }
  0x21   :  { %140 = shalt.err (!%p137_p1)
}
  0x22   :  { %33 = dma.hbm_to_vmem [thread:$0]  %s235_s1, 256, %s28_s24, [#allocation6], %s170_s19, %s170_s19, %s171_s20  }
  0x23   :  { %163 = dma.done.wait [#allocation3], 256  }
  0x24   :  { %164 = vsyncadd [#allocation3], 4294967040 }
  0x25   :  { %165 = dma.done.wait [#allocation6], 256  }
  0x26   :  { %166 = vsyncadd [#allocation6], 4294967040  ;;  %v40_v0 = vld [vmem:[#allocation2] sm:$0xff]  ;;  %v41_v1 = vld [vmem:[#allocation2 + $0x8] sm:$0xff]  ;;  %s173_s7 = smov [#allocation7]  }
  0x27   :  { %v42_v2 = vld [vmem:[#allocation5] sm:$0xff]  ;;  %v43_v3 = vld [vmem:[#allocation5 + $0x8] sm:$0xff]  ;;  %93 = vlog2.f32 %v40_v0  ;;  %s73_s8 = sshll.u32 %s173_s7, 4  ;;  %s74_s8 = int_to_ptr.vmem [resolvable:$true] %s73_s8 }
  0x28   :  { %v44_v4 = vsub.f32 %v40_v0, %v42_v2  ;;  %v45_v5 = vsub.f32 %v41_v1, %v43_v3  ;;  %95 = vlog2.f32 %v41_v1  ;;  %s141_s9 = scalar_lea.vmem %s74_s8, 256  ;;  %p146_p3 = scmp.lt.s32.totalorder %s74_s8, %s74_s8 }
  0x29   :  { %p142_p2 = scmp.ne.s32.totalorder %s74_s8, %s141_s9  ;;  %p147_p4 = scmp.lt.s32.totalorder %s141_s9, %s141_s9 }
  0x2a   :  { %v46_v6 = vmul.f32 %v44_v4, %v44_v4  ;;  %v47_v7 = vmul.f32 %v45_v5, %v45_v5 }
  0x2b   :  { %p148_p5 = por %p147_p4, %p146_p3 }
  0x2c   :  { %v48_v8 = vadd.f32 %v47_v7, %v46_v6 }
  0x2d   :  { %p149_p6 = pnand %p148_p5, %p142_p2 }
  0x2e   :  { %49 = vadd.xlane.f32.xlu0 %v48_v8 }
  0x31   :  { %v94_v16 = vpop.eup %93 }
  0x32   :  { %v96_v17 = vpop.eup %95  ;;  %v60_v18 = vmul.f32 0.6931472, %v94_v16 }
  0x33   :  { %v62_v19 = vmul.f32 0.6931472, %v96_v17 }
  0xbb   :  { %v50_v9 = vpop.xlane.xlu0 %49 }
  0xbc   :  { %v51_v10 = vrot.slane %v50_v9, 4 }
  0xbe   :  { %v52_v11 = vadd.f32 %v51_v10, %v50_v9 }
  0xc0   :  { %v53_v12 = vrot.slane %v52_v11, 2 }
  0xc2   :  { %v54_v13 = vadd.f32 %v53_v12, %v52_v11 }
  0xc4   :  { %v55_v14 = vrot.slane %v54_v13, 1 }
  0xc6   :  { %v56_v15 = vadd.f32 %v55_v14, %v54_v13 }
  0xc8   :  { %86 = vpush %v56_v15 }
  0xf9   :  { %s87_s1 = spop %86 }
  0xfa   :  { %s58_s6 = smul.f32 0.00048828125, %s87_s1 }
  0xfc   :  { %v63_v20 = vstv %s58_s6 }
  0xfd   :  { %v64_v21 = vadd.f32 %v63_v20, %v60_v18  ;;  %v65_v22 = vadd.f32 %v63_v20, %v62_v19 }
  0xff   :  { %66 = vst [vmem:[#allocation7] sm:$0xff] %v64_v21  ;;  %67 = vst [vmem:[#allocation7 + $0x8] sm:$0xff] %v65_v22 }
 0x100   :  { %152 = shalt.err (!%p149_p6)
}
 0x101   :  { %s153_s12 = scalar_lea.hbm %s236_s2, 256 }
 0x102   :  { %p154_p7 = scmp.ne.s32.totalorder %s236_s2, %s153_s12  ;;  %p157_p8 = scmp.lt.u32.totalorder %s153_s12, %s236_s2 }
 0x104   :  { %p159_p9 = pnand %p157_p8, %p154_p7 }
 0x106   :  { %162 = shalt.err (!%p159_p9)
}
 0x107   :  { %79 = dma.vmem_to_hbm [thread:$0]  %s74_s8, 256, %s236_s2, [#allocation4], %s170_s19, %s170_s19, %s171_s20  }
 0x108   :  { %167 = dma.done.wait [#allocation4], 256  }
 0x109   :  { %168 = vsyncadd [#allocation4], 4294967040 }
 0x10a   :  { %83 = vsyncpa [#allocation3], 1 }
 0x10b   :  { %84 = vsyncpa [#allocation6], 1 }
 0x10c   :  { %85 = vsyncpa [#allocation4], 1 }

</bundles_post_ra>
